<compile_context>
chip_gen: v6e
topology: v6e:2x2x1
jax: 0.10.0
libtpu: 0.0.40
codegen_flags: <defaults>
</compile_context>

<pallas_src>
import math
import numpy as np
import jax
import jax.numpy as jnp
from jax.experimental import pallas as pl
from jax.experimental.pallas import tpu as pltpu  # noqa: F401  (TPU backend import)

# --- "config" (InterACTConfig) ----------------------------------------------
DIM_MODEL = 32          # config.dim_model
N_HEADS = 4             # config.n_heads
DIM_FF = 64             # config.dim_feedforward
PRE_NORM = False        # config.pre_norm
LN_EPS = 1e-5           # nn.LayerNorm default eps
SEQ = 8                 # example sequence length
BATCH = 2               # example batch size
HEAD_DIM = DIM_MODEL // N_HEADS


def _layer_norm(x, w, b):
    mu = jnp.mean(x, axis=-1, keepdims=True)
    var = jnp.mean((x - mu) ** 2, axis=-1, keepdims=True)
    return (x - mu) * jax.lax.rsqrt(var + LN_EPS) * w + b


# --------------------------- Pallas kernel ----------------------------------
def act_encoder_layer_kernel(
    x_ref,            # (B*S, D)  input rows, batch-major
    qkvb_ref,         # (B*S, 3D) fused QKV bias (PE folded in, q part pre-scaled)
    wqkv_ref,         # (D, 3D)   fused, pre-transposed in-projection (q cols pre-scaled)
    wo_ref, bo_ref,   # (D, D) pre-transposed, (1, D)
    w1_ref, b1_ref,   # (D, F) pre-transposed, (1, F)
    w2_ref, b2_ref,   # (F, D) pre-transposed, (1, D)
    ln1w_ref, ln1b_ref, ln2w_ref, ln2b_ref,   # (1, D) each
    o_ref,            # (B*S, D)
):
    B, S, D, H, Dh = BATCH, SEQ, DIM_MODEL, N_HEADS, HEAD_DIM
    BS = B * S

    x = x_ref[...]                                   # (BS, D)
    skip = x
    if PRE_NORM:
        x = _layer_norm(x, ln1w_ref[...], ln1b_ref[...])

    # Fused QKV in-projection: (BS, D) @ (D, 3D) + (BS, 3D).
    qkv = jnp.dot(x, wqkv_ref[...], preferred_element_type=jnp.float32) + qkvb_ref[...]
    q3 = qkv[:, 0 * D:1 * D].reshape(B, S, D)        # already scaled by 1/sqrt(Dh)
    k3 = qkv[:, 1 * D:2 * D].reshape(B, S, D)
    v3 = qkv[:, 2 * D:3 * D].reshape(B, S, D)

    wo = wo_ref[...]                                 # (D, D); rows = head-concat input dim

    # Attention: heads statically unrolled, each head batched over B.
    # Output projection is accumulated per head -> no lane concatenate.
    xattn = skip + bo_ref[...]                       # residual + out-proj bias
    for h in range(H):
        sl = slice(h * Dh, (h + 1) * Dh)
        s = jnp.einsum('bqd,bkd->bqk', q3[:, :, sl], k3[:, :, sl],
                       preferred_element_type=jnp.float32)          # (B, S, S)
        s = s - jnp.max(s, axis=-1, keepdims=True)
        p = jnp.exp(s)
        p = p * pl.reciprocal(jnp.sum(p, axis=-1, keepdims=True), approx=True)
        ctx = jnp.einsum('bqk,bkd->bqd', p, v3[:, :, sl],
                         preferred_element_type=jnp.float32)         # (B, S, Dh)
        xattn = xattn + jnp.dot(ctx.reshape(BS, Dh), wo[sl, :],
                                preferred_element_type=jnp.float32)  # (BS, D)

    x = xattn                                        # dropout1 == identity (inference)

    if PRE_NORM:
        skip = x
        xn = _layer_norm(x, ln2w_ref[...], ln2b_ref[...])
    else:
        xn = _layer_norm(x, ln1w_ref[...], ln1b_ref[...])
        skip = xn

    h1 = jnp.dot(xn, w1_ref[...], preferred_element_type=jnp.float32) + b1_ref[...]
    h1 = jnp.maximum(h1, 0.0)                        # relu (feedforward_activation)
    ff = jnp.dot(h1, w2_ref[...], preferred_element_type=jnp.float32) + b2_ref[...]

    x = skip + ff                                    # dropout / dropout2 == identity
    if not PRE_NORM:
        x = _layer_norm(x, ln2w_ref[...], ln2b_ref[...])

    o_ref[...] = x


# --------------------------- wrapper -----------------------------------------
def positional_encoding(n_rows, d_model):
    """Replicates PositionalEncoding.encoding[0, :n_rows]."""
    position = jnp.arange(n_rows, dtype=jnp.float32)[:, None]
    div_term = jnp.exp(jnp.arange(0, d_model, 2, dtype=jnp.float32)
                       * (-math.log(10000.0) / d_model))
    pe = jnp.zeros((n_rows, d_model), dtype=jnp.float32)
    pe = pe.at[:, 0::2].set(jnp.sin(position * div_term))
    pe = pe.at[:, 1::2].set(jnp.cos(position * div_term))
    return pe


def act_encoder_layer(x_sbd, params):
    """x_sbd: (S, B, D) float32 (PyTorch seq-first layout). Returns (S, B, D)."""
    S, B, D = x_sbd.shape
    assert D == DIM_MODEL and S == SEQ and B == BATCH
    BS = B * S
    scale = 1.0 / math.sqrt(HEAD_DIM)

    # (S, B, D) -> batch-major (B*S, D) slab
    x2d = jnp.transpose(x_sbd, (1, 0, 2)).reshape(BS, D)

    # PE rows indexed by the *batch* dim (faithful to the PyTorch code)
    pe = positional_encoding(B, D)                                        # (B, D)

    # Fused, pre-transposed QKV weight; softmax scale folded into Q columns.
    wqkv = jnp.concatenate(
        [params["wq"].T * scale, params["wk"].T, params["wv"].T], axis=1)  # (D, 3D)

    # Per-batch fused bias with PE contribution folded in ((x+pe)@W = x@W + pe@W).
    bq = (params["bq"][None, :] + pe @ params["wq"].T) * scale            # (B, D)
    bk = params["bk"][None, :] + pe @ params["wk"].T                      # (B, D)
    bv = jnp.broadcast_to(params["bv"][None, :], (B, D))
    qkvb = jnp.repeat(jnp.concatenate([bq, bk, bv], axis=1), S, axis=0)   # (BS, 3D)

    def r2(v):   # biases / LN params as (1, N) rows so they broadcast over rows
        return v.reshape(1, -1)

    args = [
        x2d, qkvb, wqkv,
        params["wo"].T, r2(params["bo"]),
        params["w1"].T, r2(params["b1"]),
        params["w2"].T, r2(params["b2"]),
        r2(params["ln1_w"]), r2(params["ln1_b"]),
        r2(params["ln2_w"]), r2(params["ln2_b"]),
    ]

    # Single invocation: no grid, all operands resident in VMEM (total < 100 KiB).
    out2d = pl.pallas_call(
        act_encoder_layer_kernel,
        out_shape=jax.ShapeDtypeStruct((BS, D), jnp.float32),
    )(*args)

    return jnp.transpose(out2d.reshape(B, S, D), (1, 0, 2))              # (S, B, D)


# --------------------------- pure-JAX reference ------------------------------
def reference(x_sbd, params):
    S, B, D = x_sbd.shape
    pe = positional_encoding(B, D)[None]                 # (1, B, D)
    x = x_sbd
    skip = x
    if PRE_NORM:
        x = _layer_norm(x, params["ln1_w"], params["ln1_b"])
    qk = x + pe
    head_dim = D // N_HEADS
    q = qk @ params["wq"].T + params["bq"]
    k = qk @ params["wk"].T + params["bk"]
    v = x @ params["wv"].T + params["bv"]

    def split_heads(t):  # (S,B,D) -> (B,H,S,Dh)
        return t.reshape(S, B, N_HEADS, head_dim).transpose(1, 2, 0, 3)

    qh, kh, vh = split_heads(q), split_heads(k), split_heads(v)
    scores = (qh / math.sqrt(head_dim)) @ kh.transpose(0, 1, 3, 2)
    p = jax.nn.softmax(scores, axis=-1)
    oh = p @ vh                                           # (B,H,S,Dh)
    attn = oh.transpose(2, 0, 1, 3).reshape(S, B, D)
    attn = attn @ params["wo"].T + params["bo"]
    x = skip + attn
    if PRE_NORM:
        skip = x
        x = _layer_norm(x, params["ln2_w"], params["ln2_b"])
    else:
        x = _layer_norm(x, params["ln1_w"], params["ln1_b"])
        skip = x
    ff = jnp.maximum(x @ params["w1"].T + params["b1"], 0.0) @ params["w2"].T + params["b2"]
    x = skip + ff
    if not PRE_NORM:
        x = _layer_norm(x, params["ln2_w"], params["ln2_b"])
    return x


# --------------------------- main --------------------------------------------
def init_params(key, d_model, n_heads, dim_ff):
    ks = jax.random.split(key, 8)
    in_proj_w = jax.random.normal(ks[0], (3 * d_model, d_model), jnp.float32) * 0.05
    in_proj_b = jax.random.normal(ks[1], (3 * d_model,), jnp.float32) * 0.05
    return {
        "wq": in_proj_w[:d_model], "bq": in_proj_b[:d_model],
        "wk": in_proj_w[d_model:2 * d_model], "bk": in_proj_b[d_model:2 * d_model],
        "wv": in_proj_w[2 * d_model:], "bv": in_proj_b[2 * d_model:],
        "wo": jax.random.normal(ks[2], (d_model, d_model), jnp.float32) * 0.05,
        "bo": jax.random.normal(ks[3], (d_model,), jnp.float32) * 0.05,
        "w1": jax.random.normal(ks[4], (dim_ff, d_model), jnp.float32) * 0.05,
        "b1": jax.random.normal(ks[5], (dim_ff,), jnp.float32) * 0.05,
        "w2": jax.random.normal(ks[6], (d_model, dim_ff), jnp.float32) * 0.05,
        "b2": jax.random.normal(ks[7], (d_model,), jnp.float32) * 0.05,
        "ln1_w": jnp.ones((d_model,), jnp.float32),
        "ln1_b": jnp.zeros((d_model,), jnp.float32),
        "ln2_w": jnp.ones((d_model,), jnp.float32),
        "ln2_b": jnp.zeros((d_model,), jnp.float32),
    }


if __name__ == "__main__":
    key = jax.random.PRNGKey(0)
    kx, kp = jax.random.split(key)
    x = jax.random.normal(kx, (SEQ, BATCH, DIM_MODEL), jnp.float32)   # (S, B, D)
    params = init_params(kp, DIM_MODEL, N_HEADS, DIM_FF)

    out = act_encoder_layer(x, params)
    out = jax.block_until_ready(out)

    ref = jax.block_until_ready(reference(x, params))
    # Tolerance relaxed slightly vs 1e-4 because the softmax denominator uses the
    # EUP approximate reciprocal (pl.reciprocal(approx=True)).
    np.testing.assert_allclose(np.asarray(out), np.asarray(ref), atol=2e-3, rtol=2e-3)

    print("KERNEL_OK")
</pallas_src>

<mosaic_0001>
module attributes {stable_mosaic.version = 11 : i64} {
  func.func @act_encoder_layer_kernel(%arg0: memref<16x32xf32, #tpu.memory_space<vmem>>, %arg1: memref<16x96xf32, #tpu.memory_space<vmem>>, %arg2: memref<32x96xf32, #tpu.memory_space<vmem>>, %arg3: memref<32x32xf32, #tpu.memory_space<vmem>>, %arg4: memref<1x32xf32, #tpu.memory_space<vmem>>, %arg5: memref<32x64xf32, #tpu.memory_space<vmem>>, %arg6: memref<1x64xf32, #tpu.memory_space<vmem>>, %arg7: memref<64x32xf32, #tpu.memory_space<vmem>>, %arg8: memref<1x32xf32, #tpu.memory_space<vmem>>, %arg9: memref<1x32xf32, #tpu.memory_space<vmem>>, %arg10: memref<1x32xf32, #tpu.memory_space<vmem>>, %arg11: memref<1x32xf32, #tpu.memory_space<vmem>>, %arg12: memref<1x32xf32, #tpu.memory_space<vmem>>, %arg13: memref<16x32xf32, #tpu.memory_space<vmem>>) attributes {dimension_semantics = [], scalar_prefetch = 0 : i64, scratch_operands = 0 : i64, tpu.core_type = #tpu.core_type<tc>} {
    %c0 = arith.constant 0 : index
    %c0_0 = arith.constant 0 : index
    %0 = vector.load %arg0[%c0, %c0_0] : memref<16x32xf32, #tpu.memory_space<vmem>>, vector<16x32xf32>
    %c0_1 = arith.constant 0 : index
    %c0_2 = arith.constant 0 : index
    %1 = vector.load %arg2[%c0_1, %c0_2] : memref<32x96xf32, #tpu.memory_space<vmem>>, vector<32x96xf32>
    %cst = arith.constant dense<0.000000e+00> : vector<16x96xf32>
    %2 = tpu.matmul %0, %1, %cst {dimension_numbers = #tpu.dot_dimension_numbers<[1], [0], [0], [1], [0, 0, 1, 1], [], []>} : vector<16x32xf32>, vector<32x96xf32>, vector<16x96xf32> -> vector<16x96xf32>
    %c0_3 = arith.constant 0 : index
    %c0_4 = arith.constant 0 : index
    %3 = vector.load %arg1[%c0_3, %c0_4] : memref<16x96xf32, #tpu.memory_space<vmem>>, vector<16x96xf32>
    %4 = arith.addf %2, %3 : vector<16x96xf32>
    %5 = vector.extract_strided_slice %4 {offsets = [0, 0], sizes = [16, 32], strides = [1, 1]} : vector<16x96xf32> to vector<16x32xf32>
    %6 = vector.shape_cast %5 : vector<16x32xf32> to vector<2x8x32xf32>
    %7 = vector.extract_strided_slice %4 {offsets = [0, 32], sizes = [16, 32], strides = [1, 1]} : vector<16x96xf32> to vector<16x32xf32>
    %8 = vector.shape_cast %7 : vector<16x32xf32> to vector<2x8x32xf32>
    %9 = vector.extract_strided_slice %4 {offsets = [0, 64], sizes = [16, 32], strides = [1, 1]} : vector<16x96xf32> to vector<16x32xf32>
    %10 = vector.shape_cast %9 : vector<16x32xf32> to vector<2x8x32xf32>
    %c0_5 = arith.constant 0 : index
    %c0_6 = arith.constant 0 : index
    %11 = vector.load %arg3[%c0_5, %c0_6] : memref<32x32xf32, #tpu.memory_space<vmem>>, vector<32x32xf32>
    %c0_7 = arith.constant 0 : index
    %c0_8 = arith.constant 0 : index
    %12 = vector.load %arg4[%c0_7, %c0_8] : memref<1x32xf32, #tpu.memory_space<vmem>>, vector<1x32xf32>
    %13 = vector.broadcast %12 : vector<1x32xf32> to vector<16x32xf32>
    %14 = arith.addf %0, %13 : vector<16x32xf32>
    %15 = vector.extract_strided_slice %6 {offsets = [0, 0, 0], sizes = [2, 8, 8], strides = [1, 1, 1]} : vector<2x8x32xf32> to vector<2x8x8xf32>
    %16 = vector.extract_strided_slice %8 {offsets = [0, 0, 0], sizes = [2, 8, 8], strides = [1, 1, 1]} : vector<2x8x32xf32> to vector<2x8x8xf32>
    "tpu.trace_start"() <{level = 10 : i32, message = "bqd,bkd->bqk"}> : () -> ()
    %cst_9 = arith.constant dense<0.000000e+00> : vector<2x8x8xf32>
    %17 = tpu.matmul %15, %16, %cst_9 {dimension_numbers = #tpu.dot_dimension_numbers<[2], [2], [1], [1], [0, 0, 0, 1, 1, 1], [0], [0]>} : vector<2x8x8xf32>, vector<2x8x8xf32>, vector<2x8x8xf32> -> vector<2x8x8xf32>
    "tpu.trace_stop"() : () -> ()
    %cst_10 = arith.constant dense<0xFF800000> : vector<2x8xf32>
    %18 = vector.multi_reduction <maximumf>, %17, %cst_10 [2] : vector<2x8x8xf32> to vector<2x8xf32>
    %19 = vector.shape_cast %18 : vector<2x8xf32> to vector<2x8x1xf32>
    %20 = vector.broadcast %19 : vector<2x8x1xf32> to vector<2x8x8xf32>
    %21 = arith.subf %17, %20 : vector<2x8x8xf32>
    %22 = math.exp %21 : vector<2x8x8xf32>
    %cst_11 = arith.constant dense<0.000000e+00> : vector<2x8xf32>
    %23 = vector.multi_reduction <add>, %22, %cst_11 [2] : vector<2x8x8xf32> to vector<2x8xf32>
    %24 = vector.shape_cast %23 : vector<2x8xf32> to vector<2x8x1xf32>
    %25 = tpu.reciprocal %24 {approx = true} : vector<2x8x1xf32> -> vector<2x8x1xf32>
    %26 = vector.broadcast %25 : vector<2x8x1xf32> to vector<2x8x8xf32>
    %27 = arith.mulf %22, %26 : vector<2x8x8xf32>
    %28 = vector.extract_strided_slice %10 {offsets = [0, 0, 0], sizes = [2, 8, 8], strides = [1, 1, 1]} : vector<2x8x32xf32> to vector<2x8x8xf32>
    "tpu.trace_start"() <{level = 10 : i32, message = "bqk,bkd->bqd"}> : () -> ()
    %cst_12 = arith.constant dense<0.000000e+00> : vector<2x8x8xf32>
    %29 = tpu.matmul %27, %28, %cst_12 {dimension_numbers = #tpu.dot_dimension_numbers<[2], [1], [1], [2], [0, 0, 0, 1, 1, 2], [0], [0]>} : vector<2x8x8xf32>, vector<2x8x8xf32>, vector<2x8x8xf32> -> vector<2x8x8xf32>
    "tpu.trace_stop"() : () -> ()
    %30 = vector.shape_cast %29 : vector<2x8x8xf32> to vector<16x8xf32>
    %31 = vector.extract_strided_slice %11 {offsets = [0, 0], sizes = [8, 32], strides = [1, 1]} : vector<32x32xf32> to vector<8x32xf32>
    %cst_13 = arith.constant dense<0.000000e+00> : vector<16x32xf32>
    %32 = tpu.matmul %30, %31, %cst_13 {dimension_numbers = #tpu.dot_dimension_numbers<[1], [0], [0], [1], [0, 0, 1, 1], [], []>} : vector<16x8xf32>, vector<8x32xf32>, vector<16x32xf32> -> vector<16x32xf32>
    %33 = arith.addf %14, %32 : vector<16x32xf32>
    %34 = vector.extract_strided_slice %6 {offsets = [0, 0, 8], sizes = [2, 8, 8], strides = [1, 1, 1]} : vector<2x8x32xf32> to vector<2x8x8xf32>
    %35 = vector.extract_strided_slice %8 {offsets = [0, 0, 8], sizes = [2, 8, 8], strides = [1, 1, 1]} : vector<2x8x32xf32> to vector<2x8x8xf32>
    "tpu.trace_start"() <{level = 10 : i32, message = "bqd,bkd->bqk"}> : () -> ()
    %cst_14 = arith.constant dense<0.000000e+00> : vector<2x8x8xf32>
    %36 = tpu.matmul %34, %35, %cst_14 {dimension_numbers = #tpu.dot_dimension_numbers<[2], [2], [1], [1], [0, 0, 0, 1, 1, 1], [0], [0]>} : vector<2x8x8xf32>, vector<2x8x8xf32>, vector<2x8x8xf32> -> vector<2x8x8xf32>
    "tpu.trace_stop"() : () -> ()
    %cst_15 = arith.constant dense<0xFF800000> : vector<2x8xf32>
    %37 = vector.multi_reduction <maximumf>, %36, %cst_15 [2] : vector<2x8x8xf32> to vector<2x8xf32>
    %38 = vector.shape_cast %37 : vector<2x8xf32> to vector<2x8x1xf32>
    %39 = vector.broadcast %38 : vector<2x8x1xf32> to vector<2x8x8xf32>
    %40 = arith.subf %36, %39 : vector<2x8x8xf32>
    %41 = math.exp %40 : vector<2x8x8xf32>
    %cst_16 = arith.constant dense<0.000000e+00> : vector<2x8xf32>
    %42 = vector.multi_reduction <add>, %41, %cst_16 [2] : vector<2x8x8xf32> to vector<2x8xf32>
    %43 = vector.shape_cast %42 : vector<2x8xf32> to vector<2x8x1xf32>
    %44 = tpu.reciprocal %43 {approx = true} : vector<2x8x1xf32> -> vector<2x8x1xf32>
    %45 = vector.broadcast %44 : vector<2x8x1xf32> to vector<2x8x8xf32>
    %46 = arith.mulf %41, %45 : vector<2x8x8xf32>
    %47 = vector.extract_strided_slice %10 {offsets = [0, 0, 8], sizes = [2, 8, 8], strides = [1, 1, 1]} : vector<2x8x32xf32> to vector<2x8x8xf32>
    "tpu.trace_start"() <{level = 10 : i32, message = "bqk,bkd->bqd"}> : () -> ()
    %cst_17 = arith.constant dense<0.000000e+00> : vector<2x8x8xf32>
    %48 = tpu.matmul %46, %47, %cst_17 {dimension_numbers = #tpu.dot_dimension_numbers<[2], [1], [1], [2], [0, 0, 0, 1, 1, 2], [0], [0]>} : vector<2x8x8xf32>, vector<2x8x8xf32>, vector<2x8x8xf32> -> vector<2x8x8xf32>
    "tpu.trace_stop"() : () -> ()
    %49 = vector.shape_cast %48 : vector<2x8x8xf32> to vector<16x8xf32>
    %50 = vector.extract_strided_slice %11 {offsets = [8, 0], sizes = [8, 32], strides = [1, 1]} : vector<32x32xf32> to vector<8x32xf32>
    %cst_18 = arith.constant dense<0.000000e+00> : vector<16x32xf32>
    %51 = tpu.matmul %49, %50, %cst_18 {dimension_numbers = #tpu.dot_dimension_numbers<[1], [0], [0], [1], [0, 0, 1, 1], [], []>} : vector<16x8xf32>, vector<8x32xf32>, vector<16x32xf32> -> vector<16x32xf32>
    %52 = arith.addf %33, %51 : vector<16x32xf32>
    %53 = vector.extract_strided_slice %6 {offsets = [0, 0, 16], sizes = [2, 8, 8], strides = [1, 1, 1]} : vector<2x8x32xf32> to vector<2x8x8xf32>
    %54 = vector.extract_strided_slice %8 {offsets = [0, 0, 16], sizes = [2, 8, 8], strides = [1, 1, 1]} : vector<2x8x32xf32> to vector<2x8x8xf32>
    "tpu.trace_start"() <{level = 10 : i32, message = "bqd,bkd->bqk"}> : () -> ()
    %cst_19 = arith.constant dense<0.000000e+00> : vector<2x8x8xf32>
    %55 = tpu.matmul %53, %54, %cst_19 {dimension_numbers = #tpu.dot_dimension_numbers<[2], [2], [1], [1], [0, 0, 0, 1, 1, 1], [0], [0]>} : vector<2x8x8xf32>, vector<2x8x8xf32>, vector<2x8x8xf32> -> vector<2x8x8xf32>
    "tpu.trace_stop"() : () -> ()
    %cst_20 = arith.constant dense<0xFF800000> : vector<2x8xf32>
    %56 = vector.multi_reduction <maximumf>, %55, %cst_20 [2] : vector<2x8x8xf32> to vector<2x8xf32>
    %57 = vector.shape_cast %56 : vector<2x8xf32> to vector<2x8x1xf32>
    %58 = vector.broadcast %57 : vector<2x8x1xf32> to vector<2x8x8xf32>
    %59 = arith.subf %55, %58 : vector<2x8x8xf32>
    %60 = math.exp %59 : vector<2x8x8xf32>
    %cst_21 = arith.constant dense<0.000000e+00> : vector<2x8xf32>
    %61 = vector.multi_reduction <add>, %60, %cst_21 [2] : vector<2x8x8xf32> to vector<2x8xf32>
    %62 = vector.shape_cast %61 : vector<2x8xf32> to vector<2x8x1xf32>
    %63 = tpu.reciprocal %62 {approx = true} : vector<2x8x1xf32> -> vector<2x8x1xf32>
    %64 = vector.broadcast %63 : vector<2x8x1xf32> to vector<2x8x8xf32>
    %65 = arith.mulf %60, %64 : vector<2x8x8xf32>
    %66 = vector.extract_strided_slice %10 {offsets = [0, 0, 16], sizes = [2, 8, 8], strides = [1, 1, 1]} : vector<2x8x32xf32> to vector<2x8x8xf32>
    "tpu.trace_start"() <{level = 10 : i32, message = "bqk,bkd->bqd"}> : () -> ()
    %cst_22 = arith.constant dense<0.000000e+00> : vector<2x8x8xf32>
    %67 = tpu.matmul %65, %66, %cst_22 {dimension_numbers = #tpu.dot_dimension_numbers<[2], [1], [1], [2], [0, 0, 0, 1, 1, 2], [0], [0]>} : vector<2x8x8xf32>, vector<2x8x8xf32>, vector<2x8x8xf32> -> vector<2x8x8xf32>
    "tpu.trace_stop"() : () -> ()
    %68 = vector.shape_cast %67 : vector<2x8x8xf32> to vector<16x8xf32>
    %69 = vector.extract_strided_slice %11 {offsets = [16, 0], sizes = [8, 32], strides = [1, 1]} : vector<32x32xf32> to vector<8x32xf32>
    %cst_23 = arith.constant dense<0.000000e+00> : vector<16x32xf32>
    %70 = tpu.matmul %68, %69, %cst_23 {dimension_numbers = #tpu.dot_dimension_numbers<[1], [0], [0], [1], [0, 0, 1, 1], [], []>} : vector<16x8xf32>, vector<8x32xf32>, vector<16x32xf32> -> vector<16x32xf32>
    %71 = arith.addf %52, %70 : vector<16x32xf32>
    %72 = vector.extract_strided_slice %6 {offsets = [0, 0, 24], sizes = [2, 8, 8], strides = [1, 1, 1]} : vector<2x8x32xf32> to vector<2x8x8xf32>
    %73 = vector.extract_strided_slice %8 {offsets = [0, 0, 24], sizes = [2, 8, 8], strides = [1, 1, 1]} : vector<2x8x32xf32> to vector<2x8x8xf32>
    "tpu.trace_start"() <{level = 10 : i32, message = "bqd,bkd->bqk"}> : () -> ()
    %cst_24 = arith.constant dense<0.000000e+00> : vector<2x8x8xf32>
    %74 = tpu.matmul %72, %73, %cst_24 {dimension_numbers = #tpu.dot_dimension_numbers<[2], [2], [1], [1], [0, 0, 0, 1, 1, 1], [0], [0]>} : vector<2x8x8xf32>, vector<2x8x8xf32>, vector<2x8x8xf32> -> vector<2x8x8xf32>
    "tpu.trace_stop"() : () -> ()
    %cst_25 = arith.constant dense<0xFF800000> : vector<2x8xf32>
    %75 = vector.multi_reduction <maximumf>, %74, %cst_25 [2] : vector<2x8x8xf32> to vector<2x8xf32>
    %76 = vector.shape_cast %75 : vector<2x8xf32> to vector<2x8x1xf32>
    %77 = vector.broadcast %76 : vector<2x8x1xf32> to vector<2x8x8xf32>
    %78 = arith.subf %74, %77 : vector<2x8x8xf32>
    %79 = math.exp %78 : vector<2x8x8xf32>
    %cst_26 = arith.constant dense<0.000000e+00> : vector<2x8xf32>
    %80 = vector.multi_reduction <add>, %79, %cst_26 [2] : vector<2x8x8xf32> to vector<2x8xf32>
    %81 = vector.shape_cast %80 : vector<2x8xf32> to vector<2x8x1xf32>
    %82 = tpu.reciprocal %81 {approx = true} : vector<2x8x1xf32> -> vector<2x8x1xf32>
    %83 = vector.broadcast %82 : vector<2x8x1xf32> to vector<2x8x8xf32>
    %84 = arith.mulf %79, %83 : vector<2x8x8xf32>
    %85 = vector.extract_strided_slice %10 {offsets = [0, 0, 24], sizes = [2, 8, 8], strides = [1, 1, 1]} : vector<2x8x32xf32> to vector<2x8x8xf32>
    "tpu.trace_start"() <{level = 10 : i32, message = "bqk,bkd->bqd"}> : () -> ()
    %cst_27 = arith.constant dense<0.000000e+00> : vector<2x8x8xf32>
    %86 = tpu.matmul %84, %85, %cst_27 {dimension_numbers = #tpu.dot_dimension_numbers<[2], [1], [1], [2], [0, 0, 0, 1, 1, 2], [0], [0]>} : vector<2x8x8xf32>, vector<2x8x8xf32>, vector<2x8x8xf32> -> vector<2x8x8xf32>
    "tpu.trace_stop"() : () -> ()
    %87 = vector.shape_cast %86 : vector<2x8x8xf32> to vector<16x8xf32>
    %88 = vector.extract_strided_slice %11 {offsets = [24, 0], sizes = [8, 32], strides = [1, 1]} : vector<32x32xf32> to vector<8x32xf32>
    %cst_28 = arith.constant dense<0.000000e+00> : vector<16x32xf32>
    %89 = tpu.matmul %87, %88, %cst_28 {dimension_numbers = #tpu.dot_dimension_numbers<[1], [0], [0], [1], [0, 0, 1, 1], [], []>} : vector<16x8xf32>, vector<8x32xf32>, vector<16x32xf32> -> vector<16x32xf32>
    %90 = arith.addf %71, %89 : vector<16x32xf32>
    %c0_29 = arith.constant 0 : index
    %c0_30 = arith.constant 0 : index
    %91 = vector.load %arg9[%c0_29, %c0_30] : memref<1x32xf32, #tpu.memory_space<vmem>>, vector<1x32xf32>
    %c0_31 = arith.constant 0 : index
    %c0_32 = arith.constant 0 : index
    %92 = vector.load %arg10[%c0_31, %c0_32] : memref<1x32xf32, #tpu.memory_space<vmem>>, vector<1x32xf32>
    %cst_33 = arith.constant dense<0.000000e+00> : vector<16xf32>
    %93 = vector.multi_reduction <add>, %90, %cst_33 [1] : vector<16x32xf32> to vector<16xf32>
    %94 = vector.shape_cast %93 : vector<16xf32> to vector<16x1xf32>
    %cst_34 = arith.constant 3.200000e+01 : f32
    %95 = vector.broadcast %cst_34 : f32 to vector<16x1xf32>
    %96 = arith.divf %94, %95 : vector<16x1xf32>
    %97 = vector.broadcast %96 : vector<16x1xf32> to vector<16x32xf32>
    %98 = arith.subf %90, %97 : vector<16x32xf32>
    %99 = arith.mulf %98, %98 : vector<16x32xf32>
    %cst_35 = arith.constant dense<0.000000e+00> : vector<16xf32>
    %100 = vector.multi_reduction <add>, %99, %cst_35 [1] : vector<16x32xf32> to vector<16xf32>
    %101 = vector.shape_cast %100 : vector<16xf32> to vector<16x1xf32>
    %cst_36 = arith.constant 3.200000e+01 : f32
    %102 = vector.broadcast %cst_36 : f32 to vector<16x1xf32>
    %103 = arith.divf %101, %102 : vector<16x1xf32>
    %104 = vector.broadcast %96 : vector<16x1xf32> to vector<16x32xf32>
    %105 = arith.subf %90, %104 : vector<16x32xf32>
    %cst_37 = arith.constant 9.99999974E-6 : f32
    %106 = vector.broadcast %cst_37 : f32 to vector<16x1xf32>
    %107 = arith.addf %103, %106 : vector<16x1xf32>
    %108 = math.rsqrt %107 : vector<16x1xf32>
    %109 = vector.broadcast %108 : vector<16x1xf32> to vector<16x32xf32>
    %110 = arith.mulf %105, %109 : vector<16x32xf32>
    %111 = vector.broadcast %91 : vector<1x32xf32> to vector<16x32xf32>
    %112 = arith.mulf %110, %111 : vector<16x32xf32>
    %113 = vector.broadcast %92 : vector<1x32xf32> to vector<16x32xf32>
    %114 = arith.addf %112, %113 : vector<16x32xf32>
    %c0_38 = arith.constant 0 : index
    %c0_39 = arith.constant 0 : index
    %115 = vector.load %arg5[%c0_38, %c0_39] : memref<32x64xf32, #tpu.memory_space<vmem>>, vector<32x64xf32>
    %cst_40 = arith.constant dense<0.000000e+00> : vector<16x64xf32>
    %116 = tpu.matmul %114, %115, %cst_40 {dimension_numbers = #tpu.dot_dimension_numbers<[1], [0], [0], [1], [0, 0, 1, 1], [], []>} : vector<16x32xf32>, vector<32x64xf32>, vector<16x64xf32> -> vector<16x64xf32>
    %c0_41 = arith.constant 0 : index
    %c0_42 = arith.constant 0 : index
    %117 = vector.load %arg6[%c0_41, %c0_42] : memref<1x64xf32, #tpu.memory_space<vmem>>, vector<1x64xf32>
    %118 = vector.broadcast %117 : vector<1x64xf32> to vector<16x64xf32>
    %119 = arith.addf %116, %118 : vector<16x64xf32>
    %cst_43 = arith.constant 0.000000e+00 : f32
    %120 = vector.broadcast %cst_43 : f32 to vector<16x64xf32>
    %121 = arith.maximumf %119, %120 : vector<16x64xf32>
    %c0_44 = arith.constant 0 : index
    %c0_45 = arith.constant 0 : index
    %122 = vector.load %arg7[%c0_44, %c0_45] : memref<64x32xf32, #tpu.memory_space<vmem>>, vector<64x32xf32>
    %cst_46 = arith.constant dense<0.000000e+00> : vector<16x32xf32>
    %123 = tpu.matmul %121, %122, %cst_46 {dimension_numbers = #tpu.dot_dimension_numbers<[1], [0], [0], [1], [0, 0, 1, 1], [], []>} : vector<16x64xf32>, vector<64x32xf32>, vector<16x32xf32> -> vector<16x32xf32>
    %c0_47 = arith.constant 0 : index
    %c0_48 = arith.constant 0 : index
    %124 = vector.load %arg8[%c0_47, %c0_48] : memref<1x32xf32, #tpu.memory_space<vmem>>, vector<1x32xf32>
    %125 = vector.broadcast %124 : vector<1x32xf32> to vector<16x32xf32>
    %126 = arith.addf %123, %125 : vector<16x32xf32>
    %127 = arith.addf %114, %126 : vector<16x32xf32>
    %c0_49 = arith.constant 0 : index
    %c0_50 = arith.constant 0 : index
    %128 = vector.load %arg11[%c0_49, %c0_50] : memref<1x32xf32, #tpu.memory_space<vmem>>, vector<1x32xf32>
    %c0_51 = arith.constant 0 : index
    %c0_52 = arith.constant 0 : index
    %129 = vector.load %arg12[%c0_51, %c0_52] : memref<1x32xf32, #tpu.memory_space<vmem>>, vector<1x32xf32>
    %cst_53 = arith.constant dense<0.000000e+00> : vector<16xf32>
    %130 = vector.multi_reduction <add>, %127, %cst_53 [1] : vector<16x32xf32> to vector<16xf32>
    %131 = vector.shape_cast %130 : vector<16xf32> to vector<16x1xf32>
    %cst_54 = arith.constant 3.200000e+01 : f32
    %132 = vector.broadcast %cst_54 : f32 to vector<16x1xf32>
    %133 = arith.divf %131, %132 : vector<16x1xf32>
    %134 = vector.broadcast %133 : vector<16x1xf32> to vector<16x32xf32>
    %135 = arith.subf %127, %134 : vector<16x32xf32>
    %136 = arith.mulf %135, %135 : vector<16x32xf32>
    %cst_55 = arith.constant dense<0.000000e+00> : vector<16xf32>
    %137 = vector.multi_reduction <add>, %136, %cst_55 [1] : vector<16x32xf32> to vector<16xf32>
    %138 = vector.shape_cast %137 : vector<16xf32> to vector<16x1xf32>
    %cst_56 = arith.constant 3.200000e+01 : f32
    %139 = vector.broadcast %cst_56 : f32 to vector<16x1xf32>
    %140 = arith.divf %138, %139 : vector<16x1xf32>
    %141 = vector.broadcast %133 : vector<16x1xf32> to vector<16x32xf32>
    %142 = arith.subf %127, %141 : vector<16x32xf32>
    %cst_57 = arith.constant 9.99999974E-6 : f32
    %143 = vector.broadcast %cst_57 : f32 to vector<16x1xf32>
    %144 = arith.addf %140, %143 : vector<16x1xf32>
    %145 = math.rsqrt %144 : vector<16x1xf32>
    %146 = vector.broadcast %145 : vector<16x1xf32> to vector<16x32xf32>
    %147 = arith.mulf %142, %146 : vector<16x32xf32>
    %148 = vector.broadcast %128 : vector<1x32xf32> to vector<16x32xf32>
    %149 = arith.mulf %147, %148 : vector<16x32xf32>
    %150 = vector.broadcast %129 : vector<1x32xf32> to vector<16x32xf32>
    %151 = arith.addf %149, %150 : vector<16x32xf32>
    %c0_58 = arith.constant 0 : index
    %c0_59 = arith.constant 0 : index
    %152 = vector.load %arg13[%c0_58, %c0_59] : memref<16x32xf32, #tpu.memory_space<vmem>>, vector<16x32xf32>
    tpu.vector_store %arg13[%c0_58, %c0_59], %151 {strides = array<i32>} : memref<16x32xf32, #tpu.memory_space<vmem>>, vector<16x32xf32>,
    return
  }
}

</mosaic_0001>

<bundles_post_ra>
// kernel: tpu_custom_call.1
= control target key start
LH: loop header
LB: loop body
LE: loop exit
PB: predicated region body
PF: predicated region fallthrough
CT: control target
= control target key end

     0   :  { %18 = vsyncpa [#allocation3], 0  ;;  %s2854_s0 = inlined_call_operand.hbm [shape: f32[16,32], index: 0, kind: input, shape index: {}]   ;;  %s2855_s1 = inlined_call_operand.hbm [shape: f32[16,96], index: 1, kind: input, shape index: {}]   ;;  %s2856_s2 = inlined_call_operand.vmem [shape: f32[32,96], index: 2, kind: input, shape index: {}]   ;;  %s2857_s3 = inlined_call_operand.vmem [shape: f32[32,32], index: 3, kind: input, shape index: {}]   ;;  %s2858_s4 = inlined_call_operand.vmem [shape: f32[1,32], index: 4, kind: input, shape index: {}]   ;;  %s2859_s5 = inlined_call_operand.vmem [shape: f32[32,64], index: 5, kind: input, shape index: {}]   ;;  %s2860_s6 = inlined_call_operand.vmem [shape: f32[1,64], index: 6, kind: input, shape index: {}]   ;;  %s2861_s7 = inlined_call_operand.vmem [shape: f32[64,32], index: 7, kind: input, shape index: {}]   ;;  %s2862_s8 = inlined_call_operand.vmem [shape: f32[1,32], index: 8, kind: input, shape index: {}]   ;;  %s2863_s9 = inlined_call_operand.vmem [shape: f32[1,32], index: 9, kind: input, shape index: {}]   ;;  %s2864_s10 = inlined_call_operand.vmem [shape: f32[1,32], index: 10, kind: input, shape index: {}]   ;;  %s2865_s11 = inlined_call_operand.vmem [shape: f32[1,32], index: 11, kind: input, shape index: {}]   ;;  %s2866_s12 = inlined_call_operand.vmem [shape: f32[1,32], index: 12, kind: input, shape index: {}]   ;;  %s2867_s13 = inlined_call_operand.hbm [shape: f32[16,32], index: 13, kind: output, shape index: {}]  }
   0x1   :  { %19 = vsyncpa [#allocation6], 0 }
   0x2   :  { %20 = vsyncpa [#allocation4], 0  ;;  %s2505_s25 = smov [#allocation2]  }
   0x3   :  { %s26_s26 = sshll.u32 %s2505_s25, 4  ;;  %s27_s26 = int_to_ptr.vmem [resolvable:$true] %s26_s26 }
   0x4   :  { %s2447_s27 = scalar_lea.vmem %s27_s26, 256  ;;  %p2452_p1 = scmp.lt.s32.totalorder %s27_s26, %s27_s26 }
   0x5   :  { %p2448_p0 = scmp.ne.s32.totalorder %s27_s26, %s2447_s27  ;;  %p2453_p2 = scmp.lt.s32.totalorder %s2447_s27, %s2447_s27 }
   0x7   :  { %p2454_p3 = por %p2453_p2, %p2452_p1 }
   0x9   :  { %p2455_p4 = pnand %p2454_p3, %p2448_p0 }
   0xb   :  { %2458 = shalt.err (!%p2455_p4)
}
   0xc   :  { %s2506_s28 = smov 128   ;;  %s2507_s29 = smov 8  }
   0xd   :  { %32 = dma.hbm_to_vmem [thread:$0]  %s2854_s0, 256, %s27_s26, [#allocation3], %s2506_s28, %s2506_s28, %s2507_s29  }
   0xe   :  { %s2508_s15 = smov [#allocation5]  }
   0xf   :  { %s38_s16 = sshll.u32 %s2508_s15, 4  ;;  %s39_s16 = int_to_ptr.vmem [resolvable:$true] %s38_s16 }
  0x10   :  { %s2467_s17 = scalar_lea.vmem %s39_s16, 256  ;;  %p2472_p6 = scmp.lt.s32.totalorder %s39_s16, %s39_s16 }
  0x11   :  { %p2468_p5 = scmp.ne.s32.totalorder %s39_s16, %s2467_s17  ;;  %p2473_p7 = scmp.lt.s32.totalorder %s2467_s17, %s2467_s17 }
  0x13   :  { %p2474_p8 = por %p2473_p7, %p2472_p6 }
  0x15   :  { %p2475_p9 = pnand %p2474_p8, %p2468_p5 }
  0x17   :  { %2478 = shalt.err (!%p2475_p9)
}
  0x18   :  { %44 = dma.hbm_to_vmem [thread:$0]  %s2855_s1, 256, %s39_s16, [#allocation6], %s2506_s28, %s2506_s28, %s2507_s29  }
  0x19   :  { %2499 = dma.done.wait [#allocation3], 256  }
  0x1a   :  { %2500 = vsyncadd [#allocation3], 4294967040 }
  0x1b   :  { %2501 = dma.done.wait [#allocation6], 256  }
  0x1c   :  { %2502 = vsyncadd [#allocation6], 4294967040  ;;  %vm81_vm0 = vcmask 261120   ;;  %v78_v0 = vld [vmem:[%s2856_s2 + $0x18] sm:$0xff]  ;;  %v77_v1 = vld [vmem:[%s2856_s2 + $0x10] sm:$0xff]  ;;  %v2509_v6 = vmov 0.0  }
  0x1d   :  { %2240 = vmatprep.subr.mxu0 %v78_v0  ;;  %v2611_v2 = vld [vmem:[#allocation2] sm:$0xff]  ;;  %v76_v3 = vld [vmem:[%s2856_s2 + $0x8] sm:$0xff]  ;;  %2256 = vmatprep.subr.mxu1 %v2509_v6  ;;  %vm2510_vm1 = vmmov 0   ;;  %v79_v8 = vld [vmem:[#allocation5] sm:$0xff]  ;;  %vm179_vm2 = vcmask 64512   ;;  %s2512_s26 = smov 64  }
  0x1e   :  { %2241 = vmatpush3.msra.mxu0 %v78_v0  ;;  %2248 = vmatprep.mubr.msk.f32.mxu0 %vm81_vm0, %v2611_v2  ;;  %v75_v4 = vld [vmem:[%s2856_s2] sm:$0xff]  ;;  %v2621_v5 = vld [vmem:[#allocation2 + $0x8] sm:$0xff]  ;;  %v80_v11 = vld [vmem:[#allocation5 + $0x8] sm:$0xff]  ;;  %s2511_s2 = smov 96   ;;  %s2513_s27 = smov 120   ;;  %vm1981_vm3 = vcmask 523264  }
  0x1f   :  { %2242 = vmatprep.subr.mxu0 %v77_v1  ;;  %2258 = vmatprep.mubr.msk.f32.mxu1 %vm2510_vm1, %v2509_v6  ;;  %s2514_s30 = smov 88   ;;  %v163_v41 = vld [vmem:[%s2857_s3] sm:$0xff]  ;;  %s2515_s18 = smov 56  }
  0x20   :  { %2243 = vmatpush3.msra.mxu0 %v77_v1  ;;  %v2687_v56 = vld [vmem:[%s2858_s4] ss:$0 sm:$0xff]  ;;  %s2516_s19 = smov 112   ;;  %s2517_s4 = smov 80  }
  0x21   :  { %2244 = vmatprep.subr.mxu0 %v76_v3  ;;  %v174_v57 = vadd.f32 %v2687_v56, %v2611_v2  ;;  %s2518_s21 = smov 48   ;;  %s2519_s22 = smov 72  }
  0x22   :  { %2245 = vmatpush3.msra.mxu0 %v76_v3  ;;  %s2520_s23 = smov 104   ;;  %s2521_s25 = smov 40  }
  0x23   :  { %2246 = vmatprep.subr.mxu0 %v75_v4  ;;  %s2522_s0 = smov [#allocation7]  }
  0x24   :  { %2247 = vmatpush3.msra.mxu0 %v75_v4  ;;  %s2116_s20 = sshll.u32 %s2522_s0, 4  ;;  %s2117_s20 = int_to_ptr.vmem [resolvable:$true] %s2116_s20 }
  0x25   :  { %2249 = vmatmul.mubr.msk.f32.vlgmr.msra.gmra.mxu0 %vm81_vm0, %v2621_v5  ;;  %2251 = vmatprep.subr.mxu0 %v2509_v6  ;;  %p2484_p11 = scmp.lt.s32.totalorder %s2117_s20, %s2117_s20 }
  0x26   :  { %2253 = vmatprep.mubr.msk.f32.mxu0 %vm2510_vm1, %v2509_v6 }
  0xe5   :  { %v2250_v7 = vpop.f32.mrf.mxu0 }
  0xe6   :  { %v2634_v12 = vadd.f32 %v2250_v7, %v80_v11 }
  0xe7   :  { %v154_v9 = vpop.f32.mrf.mxu0 }
  0xe8   :  { %v2631_v10 = vadd.f32 %v154_v9, %v79_v8 }
  0xea   :  { %177 = vrot.lane.b32.xlu0 %v2631_v10, %s2511_s2 }
  0xee   :  { %255 = vrot.lane.b32.xlu0 %v2634_v12, %s2511_s2 }
 0x15c   :  { %v178_v13 = vpop.permute.xlu0 %177 }
 0x15d   :  { %2252 = vmatpush3.xpose.msk.msra.mxu0 %vm179_vm2, %v178_v13 }
 0x15e   :  { %2261 = vmatprep.subr.mxu0 %v2509_v6 }
 0x160   :  { %2254 = vmatmul.mubr.msk.f32.vlgmr.msra.gmra.mxu0 %vm179_vm2, %v2631_v10  ;;  %v256_v14 = vpop.permute.xlu0 %255 }
 0x161   :  { %2257 = vmatpush3.xpose.msk.msra.mxu1 %vm179_vm2, %v256_v14  ;;  %2263 = vmatprep.mubr.msk.f32.mxu0 %vm2510_vm1, %v2509_v6 }
 0x162   :  { %2266 = vmatprep.subr.mxu1 %v2509_v6 }
 0x164   :  { %2259 = vmatmul.mubr.msk.f32.vlgmr.msra.gmra.mxu1 %vm179_vm2, %v2634_v12 }
 0x165   :  { %2268 = vmatprep.mubr.msk.f32.mxu1 %vm2510_vm1, %v2509_v6 }
 0x220   :  { %v250_v15 = vpop.f32.mrf.mxu0 }
 0x221   :  { %v331_v16 = vsel %vm179_vm2, %v250_v15, -inf }
 0x222   :  { %332 = vmax.xlane.f32.xlu1 %v331_v16  ;;  %v2255_v17 = vpop.f32.mrf.mxu0 }
 0x224   :  { %v327_v18 = vpop.f32.mrf.mxu1 }
 0x225   :  { %v334_v19 = vsel %vm179_vm2, %v327_v18, -inf }
 0x226   :  { %335 = vmax.xlane.f32.xlu1 %v334_v19  ;;  %v2260_v20 = vpop.f32.mrf.mxu1  ;;  %v164_v19 = vld [vmem:[%s2857_s3 + $0x8] sm:$0xff] }
 0x2ab   :  { %v333_v21 = vpop.xlane.xlu1 %332 }
 0x2ac   :  { %v337_v22 = vsub.f32 %v250_v15, %v333_v21 }
 0x2ae   :  { %v339_v23 = vmul.f32 1.442695, %v337_v22 }
 0x2af   :  { %v336_v24 = vpop.xlane.xlu1 %335 }
 0x2b0   :  { %2399 = vpow2.f32 %v339_v23  ;;  %v338_v25 = vsub.f32 %v327_v18, %v336_v24 }
 0x2b2   :  { %v341_v26 = vmul.f32 1.442695, %v338_v25 }
 0x2b4   :  { %2401 = vpow2.f32 %v341_v26 }
 0x2bd   :  { %v2400_v27 = vpop.eup %2399 }
 0x2be   :  { %v343_v28 = vsel %vm179_vm2, %v2400_v27, 0.0 }
 0x2bf   :  { %344 = vadd.xlane.f32.xlu0 %v343_v28 }
 0x2c1   :  { %v2402_v29 = vpop.eup %2401 }
 0x2c2   :  { %v346_v30 = vsel %vm179_vm2, %v2402_v29, 0.0 }
 0x2c3   :  { %347 = vadd.xlane.f32.xlu1 %v346_v30 }
 0x2d4   :  { %353 = vrot.lane.b32.xlu1 %v2631_v10, %s2512_s26 }
 0x2d5   :  { %588 = vrot.lane.b32.xlu0 %v2631_v10, %s2513_s27 }
 0x2d8   :  { %429 = vrot.lane.b32.xlu1 %v2634_v12, %s2512_s26 }
 0x2dc   :  { %590 = vrot.lane.b32.xlu1 %v2631_v10, %s2514_s30 }
 0x2e0   :  { %668 = vrot.lane.b32.xlu1 %v2634_v12, %s2514_s30 }
 0x2e4   :  { %666 = vrot.lane.b32.xlu1 %v2634_v12, %s2513_s27 }
 0x348   :  { %v345_v31 = vpop.xlane.xlu0 %344 }
 0x349   :  { %2403 = vrcp.f32 %v345_v31 }
 0x34c   :  { %v348_v32 = vpop.xlane.xlu1 %347  ;;  %v589_v40 = vpop.permute.xlu0 %588 }
 0x34d   :  { %2405 = vrcp.f32 %v348_v32 }
 0x350   :  { %v354_v33 = vpop.permute.xlu1 %353 }
 0x351   :  { %2262 = vmatpush3.msra.mxu0 %v354_v33 }
 0x352   :  { %2271 = vmatprep.subr.mxu0 %v163_v41 }
 0x354   :  { %v430_v34 = vpop.permute.xlu1 %429 }
 0x355   :  { %2267 = vmatpush3.msra.mxu1 %v430_v34  ;;  %v175_v34 = vadd.f32 %v2687_v56, %v2621_v5 }
 0x356   :  { %v2404_v35 = vpop.eup %2403  ;;  %2276 = vmatprep.subr.mxu1 %v2509_v6 }
 0x357   :  { %v351_v36 = vmul.f32 %v2404_v35, %v2400_v27 }
 0x358   :  { %v591_v39 = vpop.permute.xlu1 %590 }
 0x359   :  { %2264 = vmatmul.mubr.msk.f32.vlgmr.msra.gmra.mxu0 %vm179_vm2, %v351_v36 }
 0x35a   :  { %v2406_v37 = vpop.eup %2405  ;;  %2272 = vmatpush3.msra.mxu0 %v163_v41 }
 0x35b   :  { %v352_v38 = vmul.f32 %v2406_v37, %v2402_v29  ;;  %2281 = vmatprep.subr.mxu0 %v2509_v6 }
 0x35c   :  { %v669_v43 = vpop.permute.xlu1 %668 }
 0x35d   :  { %2269 = vmatmul.mubr.msk.f32.vlgmr.msra.gmra.mxu1 %vm179_vm2, %v352_v38 }
 0x35e   :  { %2277 = vmatpush3.xpose.msk.msra.mxu1 %vm179_vm2, %v591_v39  ;;  %2278 = vmatprep.mubr.msk.f32.mxu1 %vm2510_vm1, %v2509_v6 }
 0x35f   :  { %2286 = vmatprep.subr.mxu1 %v2509_v6 }
 0x360   :  { %v667_v47 = vpop.permute.xlu1 %666 }
 0x361   :  { %2279 = vmatmul.mubr.msk.f32.vlgmr.msra.gmra.mxu1 %vm179_vm2, %v589_v40 }
 0x362   :  { %2288 = vmatprep.mubr.msk.f32.mxu1 %vm2510_vm1, %v2509_v6 }
 0x419   :  { %v425_v42 = vpop.f32.mrf.mxu0 }
 0x41a   :  { %2273 = vmatprep.mubr.msk.f32.mxu0 %vm179_vm2, %v425_v42 }
 0x41b   :  { %v2265_v44 = vpop.f32.mrf.mxu0 }
 0x41d   :  { %v501_v45 = vpop.f32.mrf.mxu1 }
 0x41e   :  { %2274 = vmatmul.mubr.msk.f32.vlgmr.msra.gmra.mxu0 %vm179_vm2, %v501_v45 }
 0x41f   :  { %2282 = vmatpush3.xpose.msk.msra.mxu0 %vm179_vm2, %v669_v43  ;;  %v2270_v46 = vpop.f32.mrf.mxu1  ;;  %2283 = vmatprep.mubr.msk.f32.mxu0 %vm2510_vm1, %v2509_v6 }
 0x420   :  { %2291 = vmatprep.subr.mxu0 %v2509_v6 }
 0x421   :  { %v662_v48 = vpop.f32.mrf.mxu1 }
 0x422   :  { %2284 = vmatmul.mubr.msk.f32.vlgmr.msra.gmra.mxu0 %vm179_vm2, %v667_v47  ;;  %v744_v49 = vsel %vm179_vm2, %v662_v48, -inf }
 0x423   :  { %745 = vmax.xlane.f32.xlu1 %v744_v49  ;;  %v2280_v50 = vpop.f32.mrf.mxu1  ;;  %2293 = vmatprep.mubr.msk.f32.mxu0 %vm2510_vm1, %v2509_v6 }
 0x4ac   :  { %v746_v51 = vpop.xlane.xlu1 %745 }
 0x4ad   :  { %v750_v52 = vsub.f32 %v662_v48, %v746_v51  ;;  %v165_v51 = vld [vmem:[%s2857_s3 + $0x10] sm:$0xff] }
 0x4af   :  { %v752_v53 = vmul.f32 1.442695, %v750_v52 }
 0x4b1   :  { %2407 = vpow2.f32 %v752_v53 }
 0x4be   :  { %v2408_v54 = vpop.eup %2407 }
 0x4bf   :  { %v756_v55 = vsel %vm179_vm2, %v2408_v54, 0.0 }
 0x4c0   :  { %757 = vadd.xlane.f32.xlu1 %v756_v55 }
 0x4de   :  { %v2691_v58 = vpop.f32.mrf.mxu0 }
 0x4df   :  { %v587_v35 = vadd.f32 %v2691_v58, %v175_v34 }
 0x4e0   :  { %v577_v59 = vpop.f32.mrf.mxu0 }
 0x4e1   :  { %v2693_v60 = vadd.f32 %v577_v59, %v174_v57 }
 0x4e2   :  { %v740_v61 = vpop.f32.mrf.mxu0 }
 0x4e3   :  { %v747_v62 = vsel %vm179_vm2, %v740_v61, -inf }
 0x4e4   :  { %748 = vmax.xlane.f32.xlu0 %v747_v62  ;;  %v2285_v63 = vpop.f32.mrf.mxu0 }
 0x4fa   :  { %842 = vrot.lane.b32.xlu0 %v2634_v12, %s2515_s18 }
 0x4fe   :  { %1001 = vrot.lane.b32.xlu0 %v2631_v10, %s2516_s19 }
 0x549   :  { %v758_v8 = vpop.xlane.xlu1 %757 }
 0x56d   :  { %v749_v0 = vpop.xlane.xlu0 %748 }
 0x56e   :  { %v751_v1 = vsub.f32 %v740_v61, %v749_v0 }
 0x570   :  { %v754_v3 = vmul.f32 1.442695, %v751_v1 }
 0x571   :  { %v843_v2 = vpop.permute.xlu0 %842 }
 0x572   :  { %2409 = vpow2.f32 %v754_v3  ;;  %2292 = vmatpush3.msra.mxu0 %v843_v2 }
 0x573   :  { %2301 = vmatprep.subr.mxu0 %v2509_v6  ;;  %2411 = vrcp.f32 %v758_v8 }
 0x575   :  { %v1002_v18 = vpop.permute.xlu0 %1001 }
 0x57f   :  { %v2410_v4 = vpop.eup %2409 }
 0x580   :  { %v759_v7 = vsel %vm179_vm2, %v2410_v4, 0.0  ;;  %v2412_v11 = vpop.eup %2411 }
 0x581   :  { %760 = vadd.xlane.f32.xlu1 %v759_v7  ;;  %v764_v14 = vmul.f32 %v2412_v11, %v2408_v54 }
 0x592   :  { %766 = vrot.lane.b32.xlu1 %v2631_v10, %s2515_s18 }
 0x596   :  { %1003 = vrot.lane.b32.xlu1 %v2631_v10, %s2517_s4 }
 0x59a   :  { %1081 = vrot.lane.b32.xlu1 %v2634_v12, %s2517_s4 }
 0x59e   :  { %1079 = vrot.lane.b32.xlu1 %v2634_v12, %s2516_s19 }
 0x60a   :  { %v761_v9 = vpop.xlane.xlu1 %760 }
 0x60b   :  { %2413 = vrcp.f32 %v761_v9 }
 0x60e   :  { %v767_v13 = vpop.permute.xlu1 %766 }
 0x60f   :  { %2287 = vmatpush3.msra.mxu1 %v767_v13 }
 0x610   :  { %2289 = vmatmul.mubr.msk.f32.vlgmr.msra.gmra.mxu1 %vm179_vm2, %v764_v14  ;;  %2296 = vmatprep.subr.mxu1 %v164_v19 }
 0x611   :  { %2297 = vmatpush3.msra.mxu1 %v164_v19 }
 0x612   :  { %v1004_v17 = vpop.permute.xlu1 %1003  ;;  %2306 = vmatprep.subr.mxu1 %v2509_v6 }
 0x616   :  { %v1082_v22 = vpop.permute.xlu1 %1081 }
 0x618   :  { %v2414_v15 = vpop.eup %2413 }
 0x619   :  { %v765_v16 = vmul.f32 %v2414_v15, %v2410_v4 }
 0x61a   :  { %v1080_v25 = vpop.permute.xlu1 %1079 }
 0x61b   :  { %2294 = vmatmul.mubr.msk.f32.vlgmr.msra.gmra.mxu0 %vm179_vm2, %v765_v16 }
 0x61c   :  { %2302 = vmatpush3.xpose.msk.msra.mxu0 %vm179_vm2, %v1004_v17  ;;  %2303 = vmatprep.mubr.msk.f32.mxu0 %vm2510_vm1, %v2509_v6 }
 0x61d   :  { %2311 = vmatprep.subr.mxu0 %v2509_v6 }
 0x61f   :  { %2304 = vmatmul.mubr.msk.f32.vlgmr.msra.gmra.mxu0 %vm179_vm2, %v1002_v18 }
 0x620   :  { %2313 = vmatprep.mubr.msk.f32.mxu0 %vm2510_vm1, %v2509_v6 }
 0x6d0   :  { %v838_v20 = vpop.f32.mrf.mxu1 }
 0x6d1   :  { %2298 = vmatprep.mubr.msk.f32.mxu1 %vm179_vm2, %v838_v20 }
 0x6d2   :  { %v2290_v21 = vpop.f32.mrf.mxu1 }
 0x6db   :  { %v914_v23 = vpop.f32.mrf.mxu0 }
 0x6dc   :  { %2299 = vmatmul.mubr.msk.f32.vlgmr.msra.gmra.mxu1 %vm179_vm2, %v914_v23 }
 0x6dd   :  { %2307 = vmatpush3.xpose.msk.msra.mxu1 %vm179_vm2, %v1082_v22  ;;  %v2295_v24 = vpop.f32.mrf.mxu0  ;;  %2308 = vmatprep.mubr.msk.f32.mxu1 %vm2510_vm1, %v2509_v6 }
 0x6de   :  { %2316 = vmatprep.subr.mxu1 %v2509_v6 }
 0x6df   :  { %v1075_v26 = vpop.f32.mrf.mxu0 }
 0x6e0   :  { %2309 = vmatmul.mubr.msk.f32.vlgmr.msra.gmra.mxu1 %vm179_vm2, %v1080_v25  ;;  %v1157_v27 = vsel %vm179_vm2, %v1075_v26, -inf }
 0x6e1   :  { %1158 = vmax.xlane.f32.xlu0 %v1157_v27  ;;  %v2305_v28 = vpop.f32.mrf.mxu0  ;;  %2318 = vmatprep.mubr.msk.f32.mxu1 %vm2510_vm1, %v2509_v6 }
 0x76a   :  { %v1159_v29 = vpop.xlane.xlu0 %1158 }
 0x76b   :  { %v1163_v30 = vsub.f32 %v1075_v26, %v1159_v29 }
 0x76d   :  { %v1165_v31 = vmul.f32 1.442695, %v1163_v30 }
 0x76f   :  { %2415 = vpow2.f32 %v1165_v31 }
 0x77c   :  { %v2416_v32 = vpop.eup %2415 }
 0x77d   :  { %v1169_v33 = vsel %vm179_vm2, %v2416_v32, 0.0 }
 0x77e   :  { %1170 = vadd.xlane.f32.xlu0 %v1169_v33 }
 0x79c   :  { %v2300_v36 = vpop.f32.mrf.mxu1 }
 0x79d   :  { %v2731_v37 = vadd.f32 %v2300_v36, %v587_v35 }
 0x79e   :  { %v990_v38 = vpop.f32.mrf.mxu1 }
 0x79f   :  { %v2734_v39 = vadd.f32 %v990_v38, %v2693_v60 }
 0x7a0   :  { %v1153_v40 = vpop.f32.mrf.mxu1 }
 0x7a1   :  { %v1160_v41 = vsel %vm179_vm2, %v1153_v40, -inf }
 0x7a2   :  { %1161 = vmax.xlane.f32.xlu1 %v1160_v41  ;;  %v2310_v42 = vpop.f32.mrf.mxu1 }
 0x7b3   :  { %1179 = vrot.lane.b32.xlu1 %v2631_v10, %s2518_s21 }
 0x7b7   :  { %1416 = vrot.lane.b32.xlu1 %v2631_v10, %s2519_s22 }
 0x7bb   :  { %1494 = vrot.lane.b32.xlu1 %v2634_v12, %s2519_s22 }
 0x7bf   :  { %1492 = vrot.lane.b32.xlu1 %v2634_v12, %s2520_s23 }
 0x807   :  { %v1171_v5 = vpop.xlane.xlu0 %1170 }
 0x808   :  { %2417 = vrcp.f32 %v1171_v5 }
 0x815   :  { %v2418_v44 = vpop.eup %2417 }
 0x816   :  { %v1177_v48 = vmul.f32 %v2418_v44, %v2416_v32 }
 0x82b   :  { %v1162_v43 = vpop.xlane.xlu1 %1161 }
 0x82c   :  { %v1164_v45 = vsub.f32 %v1153_v40, %v1162_v43 }
 0x82e   :  { %v1167_v46 = vmul.f32 1.442695, %v1164_v45 }
 0x82f   :  { %v1180_v47 = vpop.permute.xlu1 %1179 }
 0x830   :  { %2419 = vpow2.f32 %v1167_v46  ;;  %2312 = vmatpush3.msra.mxu0 %v1180_v47 }
 0x831   :  { %2314 = vmatmul.mubr.msk.f32.vlgmr.msra.gmra.mxu0 %vm179_vm2, %v1177_v48  ;;  %2321 = vmatprep.subr.mxu0 %v165_v51 }
 0x832   :  { %2322 = vmatpush3.msra.mxu0 %v165_v51  ;;  %v1873_v51 = vld [vmem:[%s2859_s5 + $0x8] sm:$0xff] }
 0x833   :  { %2331 = vmatprep.subr.mxu0 %v2509_v6  ;;  %v1417_v56 = vpop.permute.xlu1 %1416 }
 0x837   :  { %v1495_v60 = vpop.permute.xlu1 %1494 }
 0x83b   :  { %v1493_v63 = vpop.permute.xlu1 %1492 }
 0x83d   :  { %v2420_v49 = vpop.eup %2419 }
 0x83e   :  { %v1172_v50 = vsel %vm179_vm2, %v2420_v49, 0.0 }
 0x83f   :  { %1173 = vadd.xlane.f32.xlu0 %v1172_v50  ;;  %v1874_v50 = vld [vmem:[%s2859_s5 + $0x10] sm:$0xff] }
 0x855   :  { %1255 = vrot.lane.b32.xlu0 %v2634_v12, %s2518_s21  ;;  %s2479_s21 = scalar_lea.vmem %s2117_s20, 256 }
 0x856   :  { %p2480_p10 = scmp.ne.s32.totalorder %s2117_s20, %s2479_s21  ;;  %p2485_p12 = scmp.lt.s32.totalorder %s2479_s21, %s2479_s21 }
 0x858   :  { %p2486_p13 = por %p2485_p12, %p2484_p11 }
 0x859   :  { %1414 = vrot.lane.b32.xlu0 %v2631_v10, %s2520_s23 }
 0x85a   :  { %p2487_p0 = pnand %p2486_p13, %p2480_p10 }
 0x8c8   :  { %v1174_v52 = vpop.xlane.xlu0 %1173 }
 0x8c9   :  { %2421 = vrcp.f32 %v1174_v52  ;;  %v1872_v52 = vld [vmem:[%s2859_s5] sm:$0xff] }
 0x8cc   :  { %v1256_v53 = vpop.permute.xlu0 %1255 }
 0x8cd   :  { %2317 = vmatpush3.msra.mxu1 %v1256_v53  ;;  %v1973_v53 = vld [vmem:[%s2861_s7 + $0x38] sm:$0xff] }
 0x8ce   :  { %2326 = vmatprep.subr.mxu1 %v2509_v6 }
 0x8d0   :  { %v1415_v57 = vpop.permute.xlu0 %1414 }
 0x8d6   :  { %v2422_v54 = vpop.eup %2421 }
 0x8d7   :  { %v1178_v55 = vmul.f32 %v2422_v54, %v2420_v49  ;;  %v1875_v49 = vld [vmem:[%s2859_s5 + $0x18] sm:$0xff]  ;;  %v1972_v54 = vld [vmem:[%s2861_s7 + $0x30] sm:$0xff] }
 0x8d9   :  { %2319 = vmatmul.mubr.msk.f32.vlgmr.msra.gmra.mxu1 %vm179_vm2, %v1178_v55  ;;  %v1971_v55 = vld [vmem:[%s2861_s7 + $0x28] sm:$0xff] }
 0x8da   :  { %2327 = vmatpush3.xpose.msk.msra.mxu1 %vm179_vm2, %v1417_v56  ;;  %2328 = vmatprep.mubr.msk.f32.mxu1 %vm2510_vm1, %v2509_v6  ;;  %v1970_v56 = vld [vmem:[%s2861_s7 + $0x20] sm:$0xff] }
 0x8db   :  { %2336 = vmatprep.subr.mxu1 %v2509_v6 }
 0x8dd   :  { %2329 = vmatmul.mubr.msk.f32.vlgmr.msra.gmra.mxu1 %vm179_vm2, %v1415_v57 }
 0x8de   :  { %2338 = vmatprep.mubr.msk.f32.mxu1 %vm2510_vm1, %v2509_v6 }
 0x8f1   :  { %v1251_v58 = vpop.f32.mrf.mxu0 }
 0x8f2   :  { %2323 = vmatprep.mubr.msk.f32.mxu0 %vm179_vm2, %v1251_v58 }
 0x8f3   :  { %v2315_v59 = vpop.f32.mrf.mxu0 }
 0x999   :  { %v1327_v61 = vpop.f32.mrf.mxu1 }
 0x99a   :  { %2324 = vmatmul.mubr.msk.f32.vlgmr.msra.gmra.mxu0 %vm179_vm2, %v1327_v61 }
 0x99b   :  { %2332 = vmatpush3.xpose.msk.msra.mxu0 %vm179_vm2, %v1495_v60  ;;  %v2320_v62 = vpop.f32.mrf.mxu1  ;;  %2333 = vmatprep.mubr.msk.f32.mxu0 %vm2510_vm1, %v2509_v6 }
 0x99c   :  { %2341 = vmatprep.subr.mxu0 %v2509_v6 }
 0x99d   :  { %v1488_v0 = vpop.f32.mrf.mxu1 }
 0x99e   :  { %2334 = vmatmul.mubr.msk.f32.vlgmr.msra.gmra.mxu0 %vm179_vm2, %v1493_v63  ;;  %v1570_v1 = vsel %vm179_vm2, %v1488_v0, -inf }
 0x99f   :  { %1571 = vmax.xlane.f32.xlu0 %v1570_v1  ;;  %v2330_v3 = vpop.f32.mrf.mxu1  ;;  %2343 = vmatprep.mubr.msk.f32.mxu0 %vm2510_vm1, %v2509_v6 }
 0xa28   :  { %v1572_v2 = vpop.xlane.xlu0 %1571 }
 0xa29   :  { %v1576_v4 = vsub.f32 %v1488_v0, %v1572_v2  ;;  %v2164_v0 = vld [vmem:[%s2863_s9] ss:$0 sm:$0xff] }
 0xa2b   :  { %v1578_v7 = vmul.f32 1.442695, %v1576_v4 }
 0xa2d   :  { %2423 = vpow2.f32 %v1578_v7  ;;  %v2165_v7 = vld [vmem:[%s2864_s10] ss:$0 sm:$0xff] }
 0xa3a   :  { %v2424_v8 = vpop.eup %2423 }
 0xa3b   :  { %v1582_v9 = vsel %vm179_vm2, %v2424_v8, 0.0 }
 0xa3c   :  { %1583 = vadd.xlane.f32.xlu0 %v1582_v9 }
 0xa5a   :  { %v2325_v11 = vpop.f32.mrf.mxu0 }
 0xa5b   :  { %v1413_v13 = vadd.f32 %v2325_v11, %v2731_v37 }
 0xa5c   :  { %v1403_v14 = vpop.f32.mrf.mxu0 }
 0xa5d   :  { %v1412_v15 = vadd.f32 %v1403_v14, %v2734_v39  ;;  %v1968_v14 = vld [vmem:[%s2861_s7 + $0x10] sm:$0xff] }
 0xa5e   :  { %v1566_v16 = vpop.f32.mrf.mxu0 }
 0xa5f   :  { %v1573_v17 = vsel %vm179_vm2, %v1566_v16, -inf }
 0xa60   :  { %1574 = vmax.xlane.f32.xlu1 %v1573_v17  ;;  %v2335_v18 = vpop.f32.mrf.mxu0  ;;  %v2166_v17 = vld [vmem:[%s2860_s6] ss:$0 sm:$0xff] }
 0xa71   :  { %1592 = vrot.lane.b32.xlu1 %v2631_v10, %s2521_s25  ;;  %v166_v10 = vld [vmem:[%s2857_s3 + $0x18] sm:$0xff] }
 0xac5   :  { %v1584_v6 = vpop.xlane.xlu0 %1583 }
 0xac6   :  { %2425 = vrcp.f32 %v1584_v6 }
 0xad3   :  { %v2426_v20 = vpop.eup %2425 }
 0xad4   :  { %v1590_v24 = vmul.f32 %v2426_v20, %v2424_v8 }
 0xae9   :  { %v1575_v19 = vpop.xlane.xlu1 %1574 }
 0xaea   :  { %v1577_v21 = vsub.f32 %v1566_v16, %v1575_v19  ;;  %v1966_v16 = vld [vmem:[%s2861_s7] sm:$0xff] }
 0xaec   :  { %v1580_v22 = vmul.f32 1.442695, %v1577_v21 }
 0xaed   :  { %v1593_v23 = vpop.permute.xlu1 %1592 }
 0xaee   :  { %2427 = vpow2.f32 %v1580_v22  ;;  %2337 = vmatpush3.msra.mxu1 %v1593_v23  ;;  %v2169_v23 = vld [vmem:[%s2862_s8] ss:$0 sm:$0xff] }
 0xaef   :  { %2339 = vmatmul.mubr.msk.f32.vlgmr.msra.gmra.mxu1 %vm179_vm2, %v1590_v24  ;;  %2346 = vmatprep.subr.mxu1 %v166_v10 }
 0xaf0   :  { %2347 = vmatpush3.msra.mxu1 %v166_v10 }
 0xaf1   :  { %2362 = vmatprep.subr.mxu1 %v1973_v53 }
 0xafb   :  { %v2428_v25 = vpop.eup %2427 }
 0xafc   :  { %v1585_v26 = vsel %vm179_vm2, %v2428_v25, 0.0 }
 0xafd   :  { %1586 = vadd.xlane.f32.xlu0 %v1585_v26 }
 0xb13   :  { %1668 = vrot.lane.b32.xlu0 %v2634_v12, %s2521_s25 }
 0xb86   :  { %v1587_v27 = vpop.xlane.xlu0 %1586 }
 0xb87   :  { %2429 = vrcp.f32 %v1587_v27 }
 0xb8a   :  { %v1669_v28 = vpop.permute.xlu0 %1668 }
 0xb8b   :  { %2342 = vmatpush3.msra.mxu0 %v1669_v28 }
 0xb8c   :  { %2351 = vmatprep.subr.mxu0 %v1875_v49 }
 0xb94   :  { %v2430_v29 = vpop.eup %2429 }
 0xb95   :  { %v1591_v30 = vmul.f32 %v2430_v29, %v2428_v25 }
 0xb97   :  { %2344 = vmatmul.mubr.msk.f32.vlgmr.msra.gmra.mxu0 %vm179_vm2, %v1591_v30 }
 0xb98   :  { %2352 = vmatpush3.msra.mxu0 %v1875_v49  ;;  %v2173_v49 = vld [vmem:[%s2866_s12] ss:$0 sm:$0xff] }
 0xb99   :  { %2353 = vmatprep.subr.mxu0 %v1874_v50 }
 0xb9a   :  { %2354 = vmatpush3.msra.mxu0 %v1874_v50 }
 0xb9b   :  { %2355 = vmatprep.subr.mxu0 %v1873_v51 }
 0xb9c   :  { %2356 = vmatpush3.msra.mxu0 %v1873_v51 }
 0xb9d   :  { %2357 = vmatprep.subr.mxu0 %v1872_v52 }
 0xb9e   :  { %2358 = vmatpush3.msra.mxu0 %v1872_v52 }
 0xbaf   :  { %v1664_v31 = vpop.f32.mrf.mxu1 }
 0xbb0   :  { %2348 = vmatprep.mubr.msk.f32.mxu1 %vm179_vm2, %v1664_v31 }
 0xbb1   :  { %v2340_v32 = vpop.f32.mrf.mxu1 }
 0xc57   :  { %v1740_v33 = vpop.f32.mrf.mxu0 }
 0xc58   :  { %2349 = vmatmul.mubr.msk.f32.vlgmr.msra.gmra.mxu1 %vm179_vm2, %v1740_v33 }
 0xc59   :  { %v2345_v12 = vpop.f32.mrf.mxu0  ;;  %2363 = vmatpush3.msra.mxu1 %v1973_v53 }
 0xc5a   :  { %2364 = vmatprep.subr.mxu1 %v1972_v54 }
 0xc5b   :  { %2365 = vmatpush3.msra.mxu1 %v1972_v54 }
 0xc5c   :  { %2366 = vmatprep.subr.mxu1 %v1971_v55 }
 0xc5d   :  { %2367 = vmatpush3.msra.mxu1 %v1971_v55 }
 0xc5e   :  { %2368 = vmatprep.subr.mxu1 %v1970_v56 }
 0xc5f   :  { %2369 = vmatpush3.msra.mxu1 %v1970_v56 }
 0xd18   :  { %v2350_v34 = vpop.f32.mrf.mxu1 }
 0xd19   :  { %v1826_v35 = vadd.f32 %v2350_v34, %v1413_v13  ;;  %v1969_v13 = vld [vmem:[%s2861_s7 + $0x18] sm:$0xff] }
 0xd1a   :  { %v1816_v36 = vpop.f32.mrf.mxu1  ;;  %2370 = vmatprep.subr.mxu1 %v1969_v13 }
 0xd1b   :  { %v1825_v37 = vadd.f32 %v1816_v36, %v1412_v15  ;;  %v1832_v38 = vsel %vm81_vm0, %v1826_v35, 0.0  ;;  %2371 = vmatpush3.msra.mxu1 %v1969_v13  ;;  %v1967_v15 = vld [vmem:[%s2861_s7 + $0x8] sm:$0xff] }
 0xd1c   :  { %1833 = vadd.xlane.f32.xlu0 %v1832_v38  ;;  %2372 = vmatprep.subr.mxu1 %v1968_v14 }
 0xd1d   :  { %v1829_v39 = vsel %vm81_vm0, %v1825_v37, 0.0  ;;  %2373 = vmatpush3.msra.mxu1 %v1968_v14 }
 0xd1e   :  { %1830 = vadd.xlane.f32.xlu1 %v1829_v39  ;;  %2374 = vmatprep.subr.mxu1 %v1967_v15 }
 0xd1f   :  { %2375 = vmatpush3.msra.mxu1 %v1967_v15 }
 0xd20   :  { %2376 = vmatprep.subr.mxu1 %v1966_v16 }
 0xd21   :  { %2377 = vmatpush3.msra.mxu1 %v1966_v16 }
 0xda5   :  { %v1834_v40 = vpop.xlane.xlu0 %1833 }
 0xda6   :  { %v1837_v41 = vmul.f32 0.03125, %v1834_v40 }
 0xda7   :  { %v1831_v42 = vpop.xlane.xlu1 %1830 }
 0xda8   :  { %v1839_v5 = vsub.f32 %v1826_v35, %v1837_v41  ;;  %v1836_v43 = vmul.f32 0.03125, %v1831_v42 }
 0xdaa   :  { %v1838_v44 = vsub.f32 %v1825_v37, %v1836_v43  ;;  %v1841_v45 = vmul.f32 %v1839_v5, %v1839_v5 }
 0xdac   :  { %v1845_v46 = vsel %vm81_vm0, %v1841_v45, 0.0  ;;  %v1840_v47 = vmul.f32 %v1838_v44, %v1838_v44 }
 0xdad   :  { %1846 = vadd.xlane.f32.xlu0 %v1845_v46  ;;  %v2172_v46 = vld [vmem:[%s2865_s11] ss:$0 sm:$0xff] }
 0xdae   :  { %v1842_v48 = vsel %vm81_vm0, %v1840_v47, 0.0 }
 0xdaf   :  { %1843 = vadd.xlane.f32.xlu1 %v1842_v48 }
 0xe36   :  { %v1847_v57 = vpop.xlane.xlu0 %1846 }
 0xe37   :  { %v1849_v58 = vmul.f32 0.03125, %v1847_v57 }
 0xe38   :  { %v1844_v59 = vpop.xlane.xlu1 %1843 }
 0xe39   :  { %v1851_v60 = vadd.f32 1e-05, %v1849_v58  ;;  %v1848_v61 = vmul.f32 0.03125, %v1844_v59 }
 0xe3b   :  { %2431 = vrsqrt.f32 %v1851_v60  ;;  %v1850_v62 = vadd.f32 1e-05, %v1848_v61 }
 0xe3d   :  { %2433 = vrsqrt.f32 %v1850_v62 }
 0xe48   :  { %v2432_v63 = vpop.eup %2431 }
 0xe49   :  { %v1855_v1 = vmul.f32 %v2432_v63, %v1839_v5 }
 0xe4a   :  { %v2434_v3 = vpop.eup %2433 }
 0xe4b   :  { %v1854_v2 = vmul.f32 %v2434_v3, %v1838_v44  ;;  %v1863_v4 = vmul.f32 %v2164_v0, %v1855_v1 }
 0xe4d   :  { %v1862_v8 = vmul.f32 %v2164_v0, %v1854_v2  ;;  %v1871_v11 = vadd.f32 %v2165_v7, %v1863_v4 }
 0xe4f   :  { %v1870_v9 = vadd.f32 %v2165_v7, %v1862_v8 }
 0xe51   :  { %2359 = vmatprep.mubr.msk.f32.mxu0 %vm81_vm0, %v1870_v9 }
 0xe52   :  { %2360 = vmatmul.mubr.msk.f32.vlgmr.msra.gmra.mxu0 %vm81_vm0, %v1871_v11 }
 0xf12   :  { %v2361_v18 = vpop.f32.mrf.mxu0 }
 0xf13   :  { %v1961_v6 = vadd.f32 %v2361_v18, %v2166_v17 }
 0xf14   :  { %v1955_v19 = vpop.f32.mrf.mxu0 }
 0xf15   :  { %v1956_v20 = vadd.f32 %v2166_v17, %v1955_v19  ;;  %v1965_v22 = vmax.f32 %v1961_v6, 0.0 }
 0xf17   :  { %v1964_v21 = vmax.f32 %v1956_v20, 0.0 }
 0xf19   :  { %2378 = vmatprep.mubr.msk.f32.mxu1 %vm1981_vm3, %v1964_v21 }
 0xf1a   :  { %2379 = vmatmul.mubr.msk.f32.vlgmr.msra.gmra.mxu1 %vm1981_vm3, %v1965_v22 }
 0xfda   :  { %v2380_v24 = vpop.f32.mrf.mxu1 }
 0xfdb   :  { %v2060_v25 = vadd.f32 %v2380_v24, %v2169_v23 }
 0xfdc   :  { %v2054_v26 = vpop.f32.mrf.mxu1 }
 0xfdd   :  { %v2055_v10 = vadd.f32 %v2169_v23, %v2054_v26  ;;  %v2064_v27 = vadd.f32 %v2060_v25, %v1871_v11 }
 0xfdf   :  { %v2070_v28 = vsel %vm81_vm0, %v2064_v27, 0.0  ;;  %v2063_v29 = vadd.f32 %v2055_v10, %v1870_v9 }
 0xfe0   :  { %2071 = vadd.xlane.f32.xlu0 %v2070_v28 }
 0xfe1   :  { %v2067_v30 = vsel %vm81_vm0, %v2063_v29, 0.0 }
 0xfe2   :  { %2068 = vadd.xlane.f32.xlu1 %v2067_v30 }
0x1069   :  { %v2072_v31 = vpop.xlane.xlu0 %2071 }
0x106a   :  { %v2074_v32 = vmul.f32 0.03125, %v2072_v31 }
0x106b   :  { %v2069_v33 = vpop.xlane.xlu1 %2068 }
0x106c   :  { %v2076_v12 = vsub.f32 %v2064_v27, %v2074_v32  ;;  %v2073_v34 = vmul.f32 0.03125, %v2069_v33 }
0x106e   :  { %v2075_v35 = vsub.f32 %v2063_v29, %v2073_v34  ;;  %v2078_v36 = vmul.f32 %v2076_v12, %v2076_v12 }
0x1070   :  { %v2082_v37 = vsel %vm81_vm0, %v2078_v36, 0.0  ;;  %v2077_v38 = vmul.f32 %v2075_v35, %v2075_v35 }
0x1071   :  { %2083 = vadd.xlane.f32.xlu0 %v2082_v37 }
0x1072   :  { %v2079_v39 = vsel %vm81_vm0, %v2077_v38, 0.0 }
0x1073   :  { %2080 = vadd.xlane.f32.xlu1 %v2079_v39 }
0x10fa   :  { %v2084_v40 = vpop.xlane.xlu0 %2083 }
0x10fb   :  { %v2086_v41 = vmul.f32 0.03125, %v2084_v40 }
0x10fc   :  { %v2081_v42 = vpop.xlane.xlu1 %2080 }
0x10fd   :  { %v2088_v5 = vadd.f32 1e-05, %v2086_v41  ;;  %v2085_v43 = vmul.f32 0.03125, %v2081_v42 }
0x10ff   :  { %2435 = vrsqrt.f32 %v2088_v5  ;;  %v2087_v44 = vadd.f32 1e-05, %v2085_v43 }
0x1101   :  { %2437 = vrsqrt.f32 %v2087_v44 }
0x110c   :  { %v2436_v45 = vpop.eup %2435 }
0x110d   :  { %v2092_v47 = vmul.f32 %v2436_v45, %v2076_v12 }
0x110e   :  { %v2438_v48 = vpop.eup %2437 }
0x110f   :  { %v2091_v50 = vmul.f32 %v2438_v48, %v2075_v35  ;;  %v2100_v51 = vmul.f32 %v2172_v46, %v2092_v47 }
0x1111   :  { %v2099_v52 = vmul.f32 %v2172_v46, %v2091_v50  ;;  %v2108_v53 = vadd.f32 %v2173_v49, %v2100_v51 }
0x1113   :  { %v2107_v54 = vadd.f32 %v2173_v49, %v2099_v52  ;;  %2110 = vst.msk [vmem:[#allocation7 + $0x8] sm:$0xff] %vm81_vm0, %v2108_v53 }
0x1115   :  { %2109 = vst.msk [vmem:[#allocation7] sm:$0xff] %vm81_vm0, %v2107_v54 }
0x1116   :  { %2490 = shalt.err (!%p2487_p0)
}
0x1117   :  { %2122 = dma.vmem_to_hbm [thread:$0]  %s2117_s20, 256, %s2867_s13, [#allocation4], %s2506_s28, %s2506_s28, %s2507_s29  }
0x1118   :  { %2503 = dma.done.wait [#allocation4], 256  }
0x1119   :  { %2504 = vsyncadd [#allocation4], 4294967040 }
0x111a   :  { %2126 = vsyncpa [#allocation3], 1 }
0x111b   :  { %2127 = vsyncpa [#allocation6], 1 }
0x111c   :  { %2128 = vsyncpa [#allocation4], 1 }

</bundles_post_ra>
